<compile_context>
chip_gen: v7x
topology: tpu7x:2x2x1
jax: 0.10.0
libtpu: 0.0.40
codegen_flags: <defaults>
</compile_context>

<pallas_src>
import jax
import jax.numpy as jnp
from jax import lax
from jax.experimental import pallas as pl
from jax.experimental.pallas import tpu as pltpu


# ---------------------------------------------------------------------------
# Kernel: paste masks into image (grid_sample, bilinear, align_corners=False)
# ---------------------------------------------------------------------------
def _paste_mask_kernel(boxes_ref, mask_ref, out_ref):
    # boxes_ref: (4*N,) f32 in SMEM (flat, scalar reads)
    # mask_ref : (1, Hm, Wm) bf16 per-instance block
    # out_ref  : (1, H, W)  output block = full image for instance n (no padding)
    n = pl.program_id(0)
    Hm, Wm = mask_ref.shape[1], mask_ref.shape[2]
    H, W = out_ref.shape[1], out_ref.shape[2]

    x0 = boxes_ref[4 * n + 0]
    y0 = boxes_ref[4 * n + 1]
    x1 = boxes_ref[4 * n + 2]
    y1 = boxes_ref[4 * n + 3]

    # Affine source coordinate:  i = (t - o0) * S / (o1 - o0) - 0.5,  t = pixel + 0.5
    # -> i = pixel * a + b  with scalars a, b (one scalar divide per axis).
    eps = jnp.float32(1e-6)
    ay = jnp.float32(Hm) / jnp.maximum(y1 - y0, eps)   # guard degenerate boxes
    ax = jnp.float32(Wm) / jnp.maximum(x1 - x0, eps)
    by = (jnp.float32(0.5) - y0) * ay - jnp.float32(0.5)
    bx = (jnp.float32(0.5) - x0) * ax - jnp.float32(0.5)

    # ---- Wy: (H, Hm) tent weights ----
    ry = lax.broadcasted_iota(jnp.int32, (H, Hm), 0).astype(jnp.float32)   # image row
    sy = lax.broadcasted_iota(jnp.int32, (H, Hm), 1).astype(jnp.float32)   # src index
    wy = jnp.maximum(0.0, 1.0 - jnp.abs(ry * ay + by - sy)).astype(jnp.bfloat16)

    # ---- WxT: (Wm, W) tent weights, built already transposed (no XLU relayout) ----
    sx = lax.broadcasted_iota(jnp.int32, (Wm, W), 0).astype(jnp.float32)   # src index
    cx = lax.broadcasted_iota(jnp.int32, (Wm, W), 1).astype(jnp.float32)   # image col
    wxT = jnp.maximum(0.0, 1.0 - jnp.abs(cx * ax + bx - sx)).astype(jnp.bfloat16)

    m = mask_ref[0]                                                        # (Hm, Wm) bf16
    tmp = jnp.dot(wy, m, preferred_element_type=jnp.float32)               # (H, Wm) f32
    out = jnp.dot(tmp.astype(jnp.bfloat16), wxT,
                  preferred_element_type=jnp.float32)                      # (H, W)  f32
    out_ref[0] = out.astype(out_ref.dtype)


def paste_masks_in_image(masks, boxes, image_shape, threshold=0.5,
                         out_dtype=jnp.bfloat16):
    """Pallas equivalent of my_paste_masks_in_image (GPU / skip_empty=False path).

    masks : (N, Hm, Wm) float soft masks in [0, 1]   (N may be B*N flattened)
    boxes : (N, 4) float (x0, y0, x1, y1)
    returns (N, H, W) soft masks (the reference keeps soft float masks when
    threshold >= 0; we emit bf16 to halve the HBM writeback).
    """
    N, Hm, Wm = masks.shape
    H, W = image_shape
    if N == 0:
        return jnp.zeros((0, H, W), out_dtype)

    boxes_flat = boxes.astype(jnp.float32).reshape(-1)   # (4N,) flat -> no SMEM padding
    masks_bf16 = masks.astype(jnp.bfloat16)              # halve mask read + VMEM

    # VMEM budget: double-buffered output blocks + f32 dot intermediate + small extras.
    out_bytes = jnp.dtype(out_dtype).itemsize
    est = (2 * H * W * out_bytes        # 2x output block buffers
           + H * W * 4                  # f32 second-dot intermediate
           + 2 * Hm * Wm * 2            # 2x mask block buffers (bf16)
           + (H * 128 + 32 * W) * 4)    # tent-weight working set (rough)
    vmem_limit = int(min(max(2 * est, 32 << 20), 64 << 20))

    # out block (1, H, W): last two dims equal the full array dims -> legal, un-padded,
    # no wrapper-side crop needed.  grid=(N,) parallel -> shards across v7x's 2 TCs.
    return pl.pallas_call(
        _paste_mask_kernel,
        out_shape=jax.ShapeDtypeStruct((N, H, W), out_dtype),
        grid=(N,),
        in_specs=[
            pl.BlockSpec(memory_space=pltpu.MemorySpace.SMEM),   # boxes, whole, SMEM
            pl.BlockSpec((1, Hm, Wm), lambda n: (n, 0, 0)),      # per-instance mask
        ],
        out_specs=pl.BlockSpec((1, H, W), lambda n: (n, 0, 0)),
        compiler_params=pltpu.CompilerParams(
            dimension_semantics=("parallel",),
            vmem_limit_bytes=vmem_limit),
    )(boxes_flat, masks_bf16)


# ---------------------------------------------------------------------------
# Tracking head (nn.Linear(8, 1, bias=False)) — plain XLA per perf review:
# a (B*N, 8) @ (8, 1) matmul is launch-overhead-bound glue, not kernel material.
# ---------------------------------------------------------------------------
def tracking_head(x, w):
    """x: (M, 8), w: (1, 8) PyTorch Linear weight. -> (M, 1)."""
    return x.astype(jnp.float32) @ w.astype(jnp.float32).T


# ---------------------------------------------------------------------------
# Pure-JAX reference for the paste kernel (direct gather form of grid_sample)
# ---------------------------------------------------------------------------
def _ref_paste(masks, boxes, H, W):
    N, Hm, Wm = masks.shape
    ty = jnp.arange(H, dtype=jnp.float32) + 0.5
    tx = jnp.arange(W, dtype=jnp.float32) + 0.5

    def one(m, b):
        x0, y0, x1, y1 = b[0], b[1], b[2], b[3]
        gy = (ty - y0) / (y1 - y0) * 2.0 - 1.0
        gx = (tx - x0) / (x1 - x0) * 2.0 - 1.0
        iy = ((gy + 1.0) * Hm - 1.0) * 0.5
        ix = ((gx + 1.0) * Wm - 1.0) * 0.5
        y0i = jnp.floor(iy)
        x0i = jnp.floor(ix)
        wy1 = iy - y0i
        wx1 = ix - x0i

        def gather(yi, xi):
            vmask = ((yi >= 0) & (yi < Hm))[:, None] & ((xi >= 0) & (xi < Wm))[None, :]
            yc = jnp.clip(yi, 0, Hm - 1).astype(jnp.int32)
            xc = jnp.clip(xi, 0, Wm - 1).astype(jnp.int32)
            vals = m[yc[:, None], xc[None, :]]
            return jnp.where(vmask, vals, 0.0)

        v00 = gather(y0i, x0i)
        v01 = gather(y0i, x0i + 1.0)
        v10 = gather(y0i + 1.0, x0i)
        v11 = gather(y0i + 1.0, x0i + 1.0)
        return (v00 * (1 - wy1)[:, None] * (1 - wx1)[None, :]
                + v01 * (1 - wy1)[:, None] * wx1[None, :]
                + v10 * wy1[:, None] * (1 - wx1)[None, :]
                + v11 * wy1[:, None] * wx1[None, :])

    return jax.vmap(one)(masks, boxes)


# ---------------------------------------------------------------------------
# Minimal forward_pass analogue (glue in plain JAX, hot path in Pallas)
# ---------------------------------------------------------------------------
def forward_pass(images, per_image_boxes, per_image_masks, per_image_track_feats, w_track):
    # images: (1, B, 3, H, W) -> squeeze(0) and BGR flip (glue, matches img[[2,1,0]])
    imgs = images[0][:, ::-1, :, :].astype(jnp.float32)
    B, _, H, W = imgs.shape
    # TODO(synk): backbone / proposal_generator / roi_heads (detectron2 build_model)
    # have no in-source definition; per_image_{boxes,masks} stand in for their output.

    _, N, Hm, Wm = per_image_masks.shape
    masks_flat = per_image_masks.reshape(B * N, Hm, Wm)
    boxes_flat = per_image_boxes.reshape(B * N, 4)
    feats_flat = per_image_track_feats.reshape(B * N, -1)

    # One Pallas call for all B*N instances (un-padded output, no wrapper crop).
    pasted = paste_masks_in_image(masks_flat, boxes_flat, (H, W)).reshape(B, N, H, W)
    scores = tracking_head(feats_flat, w_track).reshape(B, N, 1)

    pred = []
    for b in range(B):
        pred.append({"instances": {"pred_masks": pasted[b],
                                   "pred_boxes": per_image_boxes[b]},
                     "features": per_image_track_feats[b],
                     "track_scores": scores[b]})
    losses = {"loss_cls": jnp.float32(0.0),
              "loss_box_reg": jnp.float32(0.0),
              "loss_mask": jnp.float32(0.0)}
    return pred, [losses]


if __name__ == "__main__":
    key = jax.random.PRNGKey(0)
    B, H, W = 2, 64, 64          # two frames, small image
    N, Hm, Wm = 4, 28, 28        # 4 instances per frame, 28x28 mask predictions

    k_img, k_mask, k_box, k_feat, k_w = jax.random.split(key, 5)

    images = jax.random.uniform(k_img, (1, B, 3, H, W), jnp.float32) * 255.0
    masks = jax.random.uniform(k_mask, (B, N, Hm, Wm), jnp.float32)          # soft in [0,1]
    # boxes: x0,y0 in [2,20], width/height in [12,35] -> stay inside image-ish
    xy0 = jax.random.uniform(k_box, (B, N, 2), jnp.float32, 2.0, 20.0)
    wh = jax.random.uniform(jax.random.fold_in(k_box, 1), (B, N, 2), jnp.float32, 12.0, 35.0)
    boxes = jnp.concatenate([xy0, xy0 + wh], axis=-1)                        # (B, N, 4)
    track_feats = jax.random.normal(k_feat, (B, N, 8), jnp.float32)
    w_track = jax.random.normal(k_w, (1, 8), jnp.float32) * 0.1              # Linear(8,1,bias=False)

    pred, losses = forward_pass(images, boxes, masks, track_feats, w_track)
    pred = jax.block_until_ready(pred)

    # correctness check against a direct-gather grid_sample reference
    # (bf16 MXU inputs + bf16 output -> ~1e-2 absolute error budget)
    for b in range(B):
        ref = _ref_paste(masks[b], boxes[b], H, W)
        got = pred[b]["instances"]["pred_masks"].astype(jnp.float32)
        assert got.shape == (N, H, W), got.shape
        assert jnp.max(jnp.abs(got - ref)) < 3e-2, float(jnp.max(jnp.abs(got - ref)))
        ref_scores = track_feats[b] @ w_track.T
        assert jnp.max(jnp.abs(pred[b]["track_scores"] - ref_scores)) < 1e-4

    print("KERNEL_OK")
</pallas_src>

<mosaic_0001>
module attributes {stable_mosaic.version = 11 : i64} {
  func.func @_paste_mask_kernel(%arg0: i32, %arg1: memref<32xf32, #tpu.memory_space<smem>>, %arg2: memref<1x28x28xbf16, #tpu.memory_space<vmem>>, %arg3: memref<1x64x64xbf16, #tpu.memory_space<vmem>>) attributes {dimension_semantics = [#tpu.dimension_semantics<parallel>], iteration_bounds = array<i64: 8>, scalar_prefetch = 0 : i64, scratch_operands = 0 : i64, tpu.core_type = #tpu.core_type<tc>, window_params = [{transform_indices = @transform_0, window_bounds = array<i64: 32>}, {transform_indices = @transform_1, window_bounds = array<i64: 1, 28, 28>}, {transform_indices = @transform_2, window_bounds = array<i64: 1, 64, 64>}]} {
    %c4_i32 = arith.constant 4 : i32
    %0 = arith.muli %c4_i32, %arg0 : i32
    %c0_i32 = arith.constant 0 : i32
    %1 = arith.addi %0, %c0_i32 : i32
    %2 = arith.index_cast %1 : i32 to index
    %3 = memref.load %arg1[%2] : memref<32xf32, #tpu.memory_space<smem>>
    %c4_i32_0 = arith.constant 4 : i32
    %4 = arith.muli %c4_i32_0, %arg0 : i32
    %c1_i32 = arith.constant 1 : i32
    %5 = arith.addi %4, %c1_i32 : i32
    %6 = arith.index_cast %5 : i32 to index
    %7 = memref.load %arg1[%6] : memref<32xf32, #tpu.memory_space<smem>>
    %c4_i32_1 = arith.constant 4 : i32
    %8 = arith.muli %c4_i32_1, %arg0 : i32
    %c2_i32 = arith.constant 2 : i32
    %9 = arith.addi %8, %c2_i32 : i32
    %10 = arith.index_cast %9 : i32 to index
    %11 = memref.load %arg1[%10] : memref<32xf32, #tpu.memory_space<smem>>
    %c4_i32_2 = arith.constant 4 : i32
    %12 = arith.muli %c4_i32_2, %arg0 : i32
    %c3_i32 = arith.constant 3 : i32
    %13 = arith.addi %12, %c3_i32 : i32
    %14 = arith.index_cast %13 : i32 to index
    %15 = memref.load %arg1[%14] : memref<32xf32, #tpu.memory_space<smem>>
    %16 = arith.subf %15, %7 : f32
    %cst = arith.constant 9.99999997E-7 : f32
    %17 = arith.maximumf %16, %cst : f32
    %cst_3 = arith.constant 2.800000e+01 : f32
    %18 = arith.divf %cst_3, %17 : f32
    %19 = arith.subf %11, %3 : f32
    %cst_4 = arith.constant 9.99999997E-7 : f32
    %20 = arith.maximumf %19, %cst_4 : f32
    %cst_5 = arith.constant 2.800000e+01 : f32
    %21 = arith.divf %cst_5, %20 : f32
    %cst_6 = arith.constant 5.000000e-01 : f32
    %22 = arith.subf %cst_6, %7 : f32
    %23 = arith.mulf %22, %18 : f32
    %cst_7 = arith.constant 5.000000e-01 : f32
    %24 = arith.subf %23, %cst_7 : f32
    %cst_8 = arith.constant 5.000000e-01 : f32
    %25 = arith.subf %cst_8, %3 : f32
    %26 = arith.mulf %25, %21 : f32
    %cst_9 = arith.constant 5.000000e-01 : f32
    %27 = arith.subf %26, %cst_9 : f32
    %28 = tpu.iota {dimensions = array<i32: 0>} : vector<64x28xi32>
    %29 = arith.sitofp %28 : vector<64x28xi32> to vector<64x28xf32>
    %30 = tpu.iota {dimensions = array<i32: 1>} : vector<64x28xi32>
    %31 = arith.sitofp %30 : vector<64x28xi32> to vector<64x28xf32>
    %32 = vector.broadcast %18 : f32 to vector<64x28xf32>
    %33 = arith.mulf %29, %32 : vector<64x28xf32>
    %34 = vector.broadcast %24 : f32 to vector<64x28xf32>
    %35 = arith.addf %33, %34 : vector<64x28xf32>
    %36 = arith.subf %35, %31 : vector<64x28xf32>
    %37 = math.absf %36 : vector<64x28xf32>
    %cst_10 = arith.constant 1.000000e+00 : f32
    %38 = vector.broadcast %cst_10 : f32 to vector<64x28xf32>
    %39 = arith.subf %38, %37 : vector<64x28xf32>
    %cst_11 = arith.constant 0.000000e+00 : f32
    %40 = vector.broadcast %cst_11 : f32 to vector<64x28xf32>
    %41 = arith.maximumf %40, %39 : vector<64x28xf32>
    %42 = arith.truncf %41 : vector<64x28xf32> to vector<64x28xbf16>
    %43 = tpu.iota {dimensions = array<i32: 0>} : vector<28x64xi32>
    %44 = arith.sitofp %43 : vector<28x64xi32> to vector<28x64xf32>
    %45 = tpu.iota {dimensions = array<i32: 1>} : vector<28x64xi32>
    %46 = arith.sitofp %45 : vector<28x64xi32> to vector<28x64xf32>
    %47 = vector.broadcast %21 : f32 to vector<28x64xf32>
    %48 = arith.mulf %46, %47 : vector<28x64xf32>
    %49 = vector.broadcast %27 : f32 to vector<28x64xf32>
    %50 = arith.addf %48, %49 : vector<28x64xf32>
    %51 = arith.subf %50, %44 : vector<28x64xf32>
    %52 = math.absf %51 : vector<28x64xf32>
    %cst_12 = arith.constant 1.000000e+00 : f32
    %53 = vector.broadcast %cst_12 : f32 to vector<28x64xf32>
    %54 = arith.subf %53, %52 : vector<28x64xf32>
    %cst_13 = arith.constant 0.000000e+00 : f32
    %55 = vector.broadcast %cst_13 : f32 to vector<28x64xf32>
    %56 = arith.maximumf %55, %54 : vector<28x64xf32>
    %57 = arith.truncf %56 : vector<28x64xf32> to vector<28x64xbf16>
    %c0 = arith.constant 0 : index
    %c0_14 = arith.constant 0 : index
    %c0_15 = arith.constant 0 : index
    %58 = vector.load %arg2[%c0, %c0_14, %c0_15] : memref<1x28x28xbf16, #tpu.memory_space<vmem>>, vector<1x28x28xbf16>
    %59 = vector.shape_cast %58 : vector<1x28x28xbf16> to vector<28x28xbf16>
    %cst_16 = arith.constant dense<0.000000e+00> : vector<64x28xf32>
    %60 = tpu.matmul %42, %59, %cst_16 {dimension_numbers = #tpu.dot_dimension_numbers<[1], [0], [0], [1], [0, 0, 1, 1], [], []>} : vector<64x28xbf16>, vector<28x28xbf16>, vector<64x28xf32> -> vector<64x28xf32>
    %61 = arith.truncf %60 : vector<64x28xf32> to vector<64x28xbf16>
    %cst_17 = arith.constant dense<0.000000e+00> : vector<64x64xf32>
    %62 = tpu.matmul %61, %57, %cst_17 {dimension_numbers = #tpu.dot_dimension_numbers<[1], [0], [0], [1], [0, 0, 1, 1], [], []>} : vector<64x28xbf16>, vector<28x64xbf16>, vector<64x64xf32> -> vector<64x64xf32>
    %63 = arith.truncf %62 : vector<64x64xf32> to vector<64x64xbf16>
    %c0_18 = arith.constant 0 : index
    %c0_19 = arith.constant 0 : index
    %c0_20 = arith.constant 0 : index
    %64 = vector.load %arg3[%c0_18, %c0_19, %c0_20] : memref<1x64x64xbf16, #tpu.memory_space<vmem>>, vector<1x64x64xbf16>
    %65 = vector.shape_cast %64 : vector<1x64x64xbf16> to vector<64x64xbf16>
    %66 = vector.shape_cast %63 : vector<64x64xbf16> to vector<1x64x64xbf16>
    tpu.vector_store %arg3[%c0_18, %c0_19, %c0_20], %66 {strides = array<i32>} : memref<1x64x64xbf16, #tpu.memory_space<vmem>>, vector<1x64x64xbf16>,
    return
  }
  func.func @transform_0(%arg0: i32) -> i32 {
    %c0_i32 = arith.constant 0 : i32
    %c0_i32_0 = arith.constant 0 : i32
    return %c0_i32 : i32
  }
  func.func @transform_1(%arg0: i32) -> (i32, i32, i32) {
    %c0_i32 = arith.constant 0 : i32
    %c0_i32_0 = arith.constant 0 : i32
    %c0_i32_1 = arith.constant 0 : i32
    return %arg0, %c0_i32, %c0_i32_0 : i32, i32, i32
  }
  func.func @transform_2(%arg0: i32) -> (i32, i32, i32) {
    %c0_i32 = arith.constant 0 : i32
    %c0_i32_0 = arith.constant 0 : i32
    %c0_i32_1 = arith.constant 0 : i32
    return %arg0, %c0_i32, %c0_i32_0 : i32, i32, i32
  }
}

</mosaic_0001>

<bundles_post_ra>
// kernel: tpu_custom_call.1
= control target key start
LH: loop header
LB: loop body
LE: loop exit
PB: predicated region body
PF: predicated region fallthrough
CT: control target
= control target key end

     0   :  { %7 = vsyncpa [#allocation4], 0  ;;  %s1030_s0 = inlined_call_operand.vmem [shape: f32[32], index: 0, kind: input, shape index: {}]   ;;  %s1031_s1 = inlined_call_operand.vmem [shape: bf16[8,28,28], index: 1, kind: input, shape index: {}]   ;;  %s1032_s2 = inlined_call_operand.hbm [shape: bf16[8,64,64], index: 2, kind: output, shape index: {}]  }
   0x1   :  { %8 = vsyncpa [#allocation3], 0 }
   0x2   :  { %10 = vsyncpa [#allocation3 + $0x1], 0  ;;  %s838_s9 = smov 0   ;;  %s840_s10 = smov 0  }
   0x3   :  { %s842_s11 = smov 0   ;;  %s844_s12 = smov 0  }
   0x4 LB: > { %s859_s13 = sadd.s32 4294967295, %s816_s12   ;;  %s589_s14 = sadd.s32 4294967294, %s816_s12   ;;  %s816_s12 = sphi %s844_s12, %s1039_s12   ;;  %s812_s11 = sphi %s842_s11, %s1038_s11   ;;  %s808_s10 = sphi %s840_s10, %s1037_s10   ;;  %s804_s9 = sphi %s838_s9, %s1036_s9  }
   0x5   : > { %s863_s15 = sadd.s32 1, %s816_s12   ;;  %s70_s16 = sadd.s32 1, %s812_s11 }
   0x6   : > { %s67_s17 = ssub.s32 %s816_s12, %s863_s15  ;;  %p80_p0 = scmp.ne.s32.totalorder %s812_s11, %s808_s10 }
   0x7   : > { %p68_p1 = scmp.eq.s32.totalorder %s67_s17, 0  ;;  %p81_p2 = scmp.eq.s32.totalorder %s859_s13, 7 }
   0x8   : > { %p86_p3 = scmp.ne.s32.totalorder %s808_s10, %s804_s9  ;;  %p87_p4 = scmp.eq.s32.totalorder %s589_s14, 7 }
   0x9   : > { %s874_s18 = scalar_select %p68_p1, %s812_s11, %s70_s16  }
   0xa   : > { %p876_p5 = por %p81_p2, %p80_p0  ;;  %p880_p6 = por %p87_p4, %p86_p3 }
   0xb   : > { %p590_p7 = scmp.ge.s32.totalorder %s816_s12, 1  ;;  %p94_p8 = scmp.lt.s32.totalorder %s816_s12, 9 }
   0xc   : > { %p690_p9 = scmp.eq.s32.totalorder %s859_s13, 0  ;;  %s107_s24 = sshll.u32 %s1030_s0, 4  ;;  %s108_s24 = int_to_ptr.vmem [resolvable:$true] %s107_s24 }
   0xd   : > { %p887_p10 = pnand %p590_p7, %p94_p8  ;;  %s735_s25 = scalar_lea.vmem %s108_s24, 16 }
   0xe   : > { %p736_p13 = scmp.ne.s32.totalorder %s108_s24, %s735_s25  ;;  %p743_p3 = scmp.lt.s32.totalorder %s108_s24, %s108_s24 }
   0xf   : > { %p682_p11 = pneg %p887_p10  ;;  %p744_p4 = scmp.lt.s32.totalorder %s735_s25, %s735_s25 }
  0x11   : > { %p683_p12 = pnand %p690_p9, %p682_p11  ;;  %p745_p7 = por %p744_p4, %p743_p3 }
  0x13   : > { %p737_p0 = pneg %p683_p12 }
  0x15   : > { %p738_p1 = pnand %p737_p0, %p736_p13 }
  0x17   : > { %p739_p2 = pneg %p738_p1 }
  0x19   : > { %p746_p8 = pnand %p745_p7, %p739_p2 }
  0x1b   : > { %749 = shalt.err (!%p746_p8)
}
  0x1c   : > { %s818_s26 = smov [#allocation2]   ;;  %128 = sbr.rel (%p887_p10) target bundleno = 591 (0x24f), region = 28 }
  0x1d   : > { %685 = dma.vmem_to_smem (!%p683_p12), %s108_s24, 16, %s818_s26, [#allocation4]  }
  0x23   : > { %795 = dma.done.wait (%p690_p9), [#allocation4], 16  }
  0x24   : > { %797 = vsyncadd (%p690_p9), [#allocation4], 4294967280 }
  0x25   : > { %134 = sfence }
  0x26   : > { %s598_s27 = sshll.u32 %s859_s13, 2  ;;  %p151_p10 = scmp.lt.s32.totalorder %s859_s13, 7  ;;  %vm307_vm0 = vcmask 1045504   ;;  %v183_v7 = vlaneseq  ;;  %vm294_vm1 = vcmask 228352   ;;  %vm492_vm2 = vcmask 519168  }
  0x27   : > { %s905_s28 = sld [smem:[#allocation2 + %s598_s27]]  ;;  %s159_s29 = sadd.s32 1, %s598_s27 }
  0x28   : > { %s907_s30 = sld [smem:[#allocation2 + %s159_s29]]  ;;  %s161_s3 = sadd.s32 2, %s598_s27  ;;  %v918_v8 = vshrl.u32 %v183_v7, 7  ;;  %v201_v18 = vand.u32 127, %v183_v7 }
  0x29   : > { %s162_s4 = sld [smem:[#allocation2 + %s161_s3]]  ;;  %s163_s5 = sadd.s32 3, %s598_s27 }
  0x2a   : > { %s164_s6 = sld [smem:[#allocation2 + %s163_s5]]  ;;  %s819_s23 = smov 1e-06   ;;  %v921_v9 = vadd.s32 8, %v918_v8  ;;  %v924_v10 = vadd.s32 16, %v918_v8  ;;  %v927_v11 = vadd.s32 24, %v918_v8  ;;  %v192_v16 = vcvt.s32.f32 %v918_v8 }
  0x2b   : > { %s152_s7 = scalar_select %p151_p10, %s859_s13, 7  ;;  %v188_v12 = vadd.s32 32, %v918_v8  ;;  %v189_v13 = vadd.s32 40, %v918_v8  ;;  %v190_v14 = vadd.s32 48, %v918_v8  ;;  %v191_v15 = vadd.s32 56, %v918_v8 }
  0x2c   : > { %v193_v17 = vcvt.s32.f32 %v921_v9  ;;  %v194_v19 = vcvt.s32.f32 %v924_v10  ;;  %v195_v20 = vcvt.s32.f32 %v927_v11  ;;  %v202_v26 = vcvt.s32.f32 %v201_v18  ;;  %s633_s17 = sshll.u32 %s859_s13, 9 }
  0x2d   : > { %s624_s8 = sshll.u32 %s152_s7, 4  ;;  %s180_s29 = ssub.f32 0.5, %s905_s28  ;;  %v196_v21 = vcvt.s32.f32 %v188_v12  ;;  %v197_v22 = vcvt.s32.f32 %v189_v13  ;;  %v198_v24 = vcvt.s32.f32 %v190_v14  ;;  %v199_v25 = vcvt.s32.f32 %v191_v15 }
  0x2e   : > { %s155_s21 = scalar_lea.vmem %s1031_s1, %s624_s8  ;;  %s177_s26 = ssub.f32 0.5, %s907_s30 }
  0x2f   : > { %s171_s14 = ssub.f32 %s162_s4, %s905_s28  ;;  %v729_v0 = vld [vmem:[%s155_s21] sm:$0xff]   ;;  %v730_v1 = vld [vmem:[%s155_s21 + $0x8] sm:$0x3f]   ;;  %s148_s8 = sand.u32 1, %s808_s10  }
  0x30   : > { %s165_s22 = ssub.f32 %s164_s6, %s907_s30  ;;  %646 = vmatprep.subr.bf16.mxu0 %v729_v0  ;;  %v309_v4 = vsel %vm307_vm0, %v730_v1, 0  ;;  %s989_s13 = scalar_lea.sflag [#allocation3], %s148_s8 }
  0x31   : > { %s172_s24 = smax.f32 %s819_s23, %s171_s14  ;;  %647 = vmatpush3.bf16.msra.mxu0 %v729_v0  ;;  %s595_s14 = sshll.u32 %s148_s8, 5 }
  0x32   : > { %s166_s25 = smax.f32 %s819_s23, %s165_s22  ;;  %v173_v2 = vstv %s172_s24  ;;  %670 = vmatprep.subr.msk.bf16.mxu0 %vm307_vm0, %v730_v1  ;;  %s150_s16 = scalar_lea.vmem [#allocation5], %s595_s14 }
  0x33   : > { %v167_v3 = vstv %s166_s25  ;;  %731 = vrcp.f32 %v173_v2  ;;  %s515_s21 = sshll.u32 %s150_s16, 4  ;;  %s980_s24 = scalar_lea.hbm %s1032_s2, %s633_s17  ;;  %s982_s21 = int_to_ptr.vmem [resolvable:$true] %s515_s21 }
  0x34   : > { %733 = vrcp.f32 %v167_v3  ;;  %s750_s25 = scalar_lea.vmem %s982_s21, 512 }
  0x35   : > { %649 = vmatpush3.bf16.msra.mxu0 %v309_v4  ;;  %p751_p9 = scmp.ne.s32.totalorder %s982_s21, %s750_s25 }
  0x37   : > { %p752_p11 = pnand %p751_p9, %p876_p5 }
  0x39   : > { %p753_p12 = pneg %p752_p11 }
  0x3d   : > { %v732_v5 = vpop.eup %731 }
  0x3e   : > { %v734_v6 = vpop.eup %733 }
  0x3f   : > { %672 = vpush %v734_v6 }
  0x40   : > { %674 = vpush %v732_v5 }
  0x70   : > { %s673_s27 = spop %672 }
  0x71   : > { %s170_s3 = smul.f32 28.0, %s673_s27  ;;  %s675_s4 = spop %674 }
  0x72   : > { %s176_s30 = smul.f32 28.0, %s675_s4 }
  0x73   : > { %s178_s5 = smul.f32 %s177_s26, %s170_s3  ;;  %v203_v23 = vstv %s170_s3  ;;  %s820_s26 = smov [#allocation5]  }
  0x74   : > { %s939_s6 = smul.f32 %s180_s29, %s176_s30  ;;  %v204_v27 = vmul.f32 %v203_v23, %v192_v16  ;;  %v205_v28 = vmul.f32 %v203_v23, %v193_v17  ;;  %v206_v29 = vmul.f32 %v203_v23, %v194_v19  ;;  %v207_v30 = vmul.f32 %v203_v23, %v195_v20  ;;  %s754_s27 = sshll.u32 %s820_s26, 4  ;;  %s755_s27 = int_to_ptr.vmem [resolvable:$false] %s754_s27 }
  0x75   : > { %s599_s28 = sadd.f32 -0.5, %s178_s5  ;;  %v208_v31 = vmul.f32 %v203_v23, %v196_v21  ;;  %v209_v32 = vmul.f32 %v203_v23, %v197_v22  ;;  %v257_v33 = vstv %s176_s30  ;;  %v210_v35 = vmul.f32 %v203_v23, %v198_v24  ;;  %s756_s29 = scalar_lea.vmem %s755_s27, 1024 }
  0x76   : > { %v211_v36 = vmul.f32 %v203_v23, %v199_v25  ;;  %v258_v37 = vmul.f32 %v257_v33, %v202_v26  ;;  %s600_s7 = sadd.f32 -0.5, %s939_s6  ;;  %p757_p13 = scmp.lt.s32.totalorder %s982_s21, %s755_s27 }
  0x77   : > { %v212_v34 = vstv %s599_s28  ;;  %p758_p0 = scmp.lt.s32.totalorder %s756_s29, %s750_s25 }
  0x78   : > { %v213_v38 = vadd.f32 %v212_v34, %v204_v27  ;;  %v214_v39 = vadd.f32 %v212_v34, %v205_v28  ;;  %v215_v40 = vadd.f32 %v212_v34, %v206_v29  ;;  %v216_v41 = vadd.f32 %v212_v34, %v207_v30 }
  0x79   : > { %v217_v42 = vadd.f32 %v212_v34, %v208_v31  ;;  %v218_v43 = vadd.f32 %v212_v34, %v209_v32  ;;  %v219_v44 = vadd.f32 %v212_v34, %v210_v35  ;;  %v220_v45 = vadd.f32 %v212_v34, %v211_v36  ;;  %p759_p1 = por %p758_p0, %p757_p13 }
  0x7a   : > { %v221_v46 = vsub.f32 %v213_v38, %v202_v26  ;;  %v222_v47 = vsub.f32 %v214_v39, %v202_v26  ;;  %v223_v48 = vsub.f32 %v215_v40, %v202_v26  ;;  %v224_v49 = vsub.f32 %v216_v41, %v202_v26 }
  0x7b   : > { %v225_v50 = vsub.f32 %v217_v42, %v202_v26  ;;  %v226_v51 = vsub.f32 %v218_v43, %v202_v26  ;;  %v227_v52 = vsub.f32 %v219_v44, %v202_v26  ;;  %v228_v53 = vsub.f32 %v220_v45, %v202_v26  ;;  %p760_p2 = pnand %p759_p1, %p753_p12 }
  0x7c   : > { %v229_v54 = vand.u32 2147483647, %v221_v46  ;;  %v230_v55 = vand.u32 2147483647, %v222_v47  ;;  %v231_v56 = vand.u32 2147483647, %v223_v48  ;;  %v259_v57 = vstv %s600_s7 }
  0x7d   : > { %v232_v58 = vand.u32 2147483647, %v224_v49  ;;  %v233_v59 = vand.u32 2147483647, %v225_v50  ;;  %v234_v60 = vand.u32 2147483647, %v226_v51  ;;  %v260_v61 = vadd.f32 %v259_v57, %v258_v37 }
  0x7e   : > { %v237_v62 = vsub.f32 1.0, %v229_v54  ;;  %v238_v63 = vsub.f32 1.0, %v230_v55  ;;  %v239_v0 = vsub.f32 1.0, %v231_v56  ;;  %v235_v1 = vand.u32 2147483647, %v227_v52 }
  0x7f   : > { %v240_v2 = vsub.f32 1.0, %v232_v58  ;;  %v241_v3 = vsub.f32 1.0, %v233_v59  ;;  %v242_v4 = vsub.f32 1.0, %v234_v60  ;;  %v236_v5 = vand.u32 2147483647, %v228_v53 }
  0x80   : > { %v245_v6 = vmax.f32 %v237_v62, 0.0  ;;  %v246_v7 = vmax.f32 %v238_v63, 0.0  ;;  %v247_v12 = vmax.f32 %v239_v0, 0.0  ;;  %v261_v21 = vsub.f32 %v260_v61, %v192_v16 }
  0x81   : > { %v248_v13 = vmax.f32 %v240_v2, 0.0  ;;  %v249_v14 = vmax.f32 %v241_v3, 0.0  ;;  %v250_v15 = vmax.f32 %v242_v4, 0.0  ;;  %v262_v22 = vsub.f32 %v260_v61, %v193_v17 }
  0x82   : > { %v253_v18 = vpack.c.bf16 %v246_v7, %v245_v6  ;;  %v243_v24 = vsub.f32 1.0, %v235_v1  ;;  %v244_v25 = vsub.f32 1.0, %v236_v5  ;;  %v263_v26 = vsub.f32 %v260_v61, %v194_v19 }
  0x83   : > { %v254_v23 = vpack.c.bf16 %v248_v13, %v247_v12  ;;  %v255_v27 = vpack.c.bf16 %v250_v15, %v249_v14  ;;  %v265_v28 = vand.u32 2147483647, %v261_v21  ;;  %v266_v29 = vand.u32 2147483647, %v262_v22 }
  0x84   : > { %650 = vmatprep.mubr.msk.bf16.mxu0 %vm294_vm1, %v253_v18  ;;  %v264_v30 = vsub.f32 %v260_v61, %v195_v20  ;;  %v267_v8 = vand.u32 2147483647, %v263_v26  ;;  %v251_v31 = vmax.f32 %v243_v24, 0.0  ;;  %v252_v32 = vmax.f32 %v244_v25, 0.0 }
  0x85   : > { %651 = vmatmul.mubr.msk.bf16.vlgmr.msra.gmra.mrb[0].mxu0 %vm294_vm1, %v254_v23  ;;  %v269_v9 = vsub.f32 1.0, %v265_v28  ;;  %v270_v16 = vsub.f32 1.0, %v266_v29 }
  0x86   : > { %654 = vmatprep.mubr.msk.bf16.mxu0 %vm294_vm1, %v255_v27  ;;  %v268_v17 = vand.u32 2147483647, %v264_v30  ;;  %v271_v10 = vsub.f32 1.0, %v267_v8  ;;  %v256_v38 = vpack.c.bf16 %v252_v32, %v251_v31 }
  0x87   : > { %v273_v19 = vmax.f32 %v269_v9, 0.0  ;;  %v274_v33 = vmax.f32 %v270_v16, 0.0 }
  0x88   : > { %v272_v34 = vsub.f32 1.0, %v268_v17  ;;  %v275_v35 = vmax.f32 %v271_v10, 0.0 }
  0x89   : > { %v277_v36 = vpack.c.bf16 %v274_v33, %v273_v19 }
  0x8a   : > { %v276_v37 = vmax.f32 %v272_v34, 0.0 }
  0x8b   : > { %658 = vmatprep.subr.bf16.mxu1 %v277_v36 }
  0x8c   : > { %v278_v11 = vpack.c.bf16 %v276_v37, %v275_v35  ;;  %659 = vmatpush3.bf16.msra.mxu1 %v277_v36 }
  0x8d   : > { %655 = vmatmul.mubr.msk.bf16.gmra.mrb[4].mxu0 %vm294_vm1, %v256_v38 }
  0x8e   : > { %671 = vmatprep.subr.msk.bf16.mxu1 %vm307_vm0, %v278_v11  ;;  %v393_v20 = vsel %vm307_vm0, %v278_v11, 0 }
  0x90   : > { %661 = vmatpush3.bf16.msra.mxu1 %v393_v20 }
 0x158   : > { %v652_v39 = vpop.f32.mrb[0].mxu0 }
 0x159   : > { %v345_v40 = vpop.f32.mrb[1].mxu0 }
 0x15a   : > { %v653_v41 = vpop.f32.mrb[2].mxu0 }
 0x15b   : > { %v377_v42 = vpack.c.bf16 %v653_v41, %v652_v39  ;;  %v348_v43 = vpop.f32.mrb[3].mxu0 }
 0x15c   : > { %v376_v44 = vpack.c.bf16 %v348_v43, %v345_v40 }
 0x15e   : > { %662 = vmatprep.mubr.msk.bf16.mxu1 %vm294_vm1, %v376_v44 }
 0x15f   : > { %663 = vmatmul.mubr.msk.bf16.vlgmr.msra.gmra.mrb[0].mxu1 %vm294_vm1, %v377_v42 }
 0x160   : > { %v656_v45 = vpop.f32.mrb[4].mxu0 }
 0x161   : > { %v361_v46 = vpop.f32.mrb[5].mxu0 }
 0x162   : > { %v657_v47 = vpop.f32.mrb[6].mxu0 }
 0x163   : > { %v379_v48 = vpack.c.bf16 %v657_v47, %v656_v45  ;;  %v364_v49 = vpop.f32.mrb[7].mxu0 }
 0x164   : > { %v378_v50 = vpack.c.bf16 %v364_v49, %v361_v46 }
 0x166   : > { %666 = vmatprep.mubr.msk.bf16.mxu1 %vm294_vm1, %v378_v50 }
 0x167   : > { %667 = vmatmul.mubr.msk.bf16.gmra.mrb[4].mxu1 %vm294_vm1, %v379_v48 }
 0x232   : > { %v664_v51 = vpop.f32.mrb[0].mxu1 }
 0x233   : > { %v627_v52 = vpack.c.bf16 %v664_v51, %v664_v51  ;;  %v429_v53 = vpop.f32.mrb[1].mxu1 }
 0x234   : > { %v625_v54 = vpack.c.bf16 %v429_v53, %v429_v53  ;;  %v665_v55 = vpop.f32.mrb[2].mxu1 }
 0x235   : > { %495 = vst.msk [vmem:[%s150_s16 + $0x8] sm:$0xf] %vm492_vm2, %v627_v52  ;;  %v628_v56 = vpack.c.bf16 %v665_v55, %v665_v55  ;;  %v432_v57 = vpop.f32.mrb[3].mxu1 }
 0x236   : > { %493 = vst.msk [vmem:[%s150_s16] sm:$0xf] %vm492_vm2, %v625_v54  ;;  %v626_v58 = vpack.c.bf16 %v432_v57, %v432_v57 }
 0x237   : > { %496 = vst.msk [vmem:[%s150_s16 + $0xc] sm:$0xf] %vm492_vm2, %v628_v56 }
 0x238   : > { %494 = vst.msk [vmem:[%s150_s16 + $0x4] sm:$0xf] %vm492_vm2, %v626_v58 }
 0x23a   : > { %v668_v59 = vpop.f32.mrb[4].mxu1 }
 0x23b   : > { %v631_v60 = vpack.c.bf16 %v668_v59, %v668_v59  ;;  %v445_v61 = vpop.f32.mrb[5].mxu1 }
 0x23c   : > { %v629_v62 = vpack.c.bf16 %v445_v61, %v445_v61  ;;  %v669_v63 = vpop.f32.mrb[6].mxu1 }
 0x23d   : > { %499 = vst.msk [vmem:[%s150_s16 + $0x18] sm:$0xf] %vm492_vm2, %v631_v60  ;;  %v632_v0 = vpack.c.bf16 %v669_v63, %v669_v63  ;;  %v448_v1 = vpop.f32.mrb[7].mxu1 }
 0x23e   : > { %497 = vst.msk [vmem:[%s150_s16 + $0x10] sm:$0xf] %vm492_vm2, %v629_v62  ;;  %v630_v2 = vpack.c.bf16 %v448_v1, %v448_v1 }
 0x23f   : > { %500 = vst.msk [vmem:[%s150_s16 + $0x1c] sm:$0xf] %vm492_vm2, %v632_v0 }
 0x240   : > { %498 = vst.msk [vmem:[%s150_s16 + $0x14] sm:$0xf] %vm492_vm2, %v630_v2 }
 0x241   : > { %763 = shalt.err (!%p760_p2)
}
 0x242   : > { %s764_s3 = scalar_lea.hbm %s980_s24, 512  ;;  %s768_s5 = scalar_lea.hbm %s1032_s2, 4096 }
 0x243   : > { %p765_p3 = scmp.ne.s32.totalorder %s980_s24, %s764_s3  ;;  %p769_p8 = scmp.lt.u32.totalorder %s980_s24, %s1032_s2 }
 0x244   : > { %p770_p10 = scmp.lt.u32.totalorder %s768_s5, %s764_s3  ;;  %p772_p11 = scmp.lt.u32.totalorder %s764_s3, %s980_s24 }
 0x245   : > { %p766_p4 = pnand %p765_p3, %p876_p5 }
 0x246   : > { %p771_p9 = por %p770_p10, %p769_p8 }
 0x247   : > { %p767_p7 = pneg %p766_p4 }
 0x248   : > { %p773_p12 = por %p772_p11, %p771_p9 }
 0x24a   : > { %p774_p13 = pnand %p773_p12, %p767_p7 }
 0x24c   : > { %777 = shalt.err (!%p774_p13)
}
 0x24d   : > { %s821_s7 = smov 64   ;;  %s822_s8 = smov 4  }
 0x24e   : > { %680 = dma.vmem_to_hbm [thread:$0]  (%p876_p5), %s982_s21, 512, %s980_s24, %s989_s13, %s821_s7, %s821_s7, %s822_s8  }
 0x24f PF: > { %p692_p0 = scmp.ge.s32.totalorder %s816_s12, 2  ;;  %s530_s14 = sand.u32 1, %s804_s9  }
 0x250   : > { %s531_s16 = scalar_lea.sflag [#allocation3], %s530_s14 }
 0x251   : > { %p687_p1 = pnand %p692_p0, %p880_p6 }
 0x253   : > { %799 = dma.done.wait (!%p687_p1), %s531_s16, 512  }
 0x254   : > { %801 = vsyncadd (!%p687_p1), %s531_s16, 4294966784  ;;  %p13_p2 = scmp.ge.s32.totalorder %s863_s15, 10   ;;  %s1036_s9 = smov %s808_s10 }
 0x255   : > { %s1037_s10 = smov %s812_s11  ;;  %s1038_s11 = smov %s874_s18 }
 0x256   : > { %s1039_s12 = smov %s863_s15  ;;  %15 = sbr.rel (!%p13_p2) target bundleno = 4 (0x4), region = 68 }
 0x25d   :  { %536 = vsyncpa [#allocation3], 1 }
 0x25e   :  { %538 = vsyncpa [#allocation3 + $0x1], 1 }
 0x25f   :  { %539 = vsyncpa [#allocation4], 1 }
 0x260   :  { %541 = vsyncpa [#allocation4 + $0x1], 1 }

</bundles_post_ra>
